<compile_context>
chip_gen: v7x
topology: tpu7x:2x2x1
jax: 0.10.0
libtpu: 0.0.40
codegen_flags: <defaults>
</compile_context>

<pallas_src>
import math

import numpy as np
import jax
import jax.numpy as jnp
from jax.experimental import pallas as pl
from jax.experimental.pallas import tpu as pltpu

VERTICAL = 0    # Direction.VERTICAL
HORIZONTAL = 1  # Direction.HORIZONTAL

_LANE = 128


# ----------------------------------------------------------------------------
# Host-side construction of the permutation + IDCT matrix (deterministic).
# ----------------------------------------------------------------------------
def _np_dct_matrix(N):
    """Orthonormal DCT-II matrix C with C[k, n]; ortho IDCT is C^T @ x."""
    n = np.arange(N)[None, :]
    k = np.arange(N)[:, None]
    C = np.sqrt(2.0 / N) * np.cos(np.pi * k * (2 * n + 1) / (2 * N))
    C[0, :] *= 1.0 / np.sqrt(2.0)
    return C


def _build_idct_perm_matrix(stride):
    """E_T such that block_pixels_rowmajor = coef_vector @ E_T.

    Combines permuteIdctCoefs (cee/coo/coe/ceo scatter) with the 2D ortho IDCT
    Y = CY^T @ V @ CX.  Returned as float64 numpy (cast at use time).
    """
    decY, decX = stride[VERTICAL], stride[HORIZONTAL]
    CY = _np_dct_matrix(decY)
    CX = _np_dct_matrix(decX)
    chY, chX = math.ceil(decY / 2.0), math.ceil(decX / 2.0)
    fhY, fhX = decY // 2, decX // 2
    nDecs = decY * decX

    ky = np.zeros(nDecs, dtype=np.int64)
    kx = np.zeros(nDecs, dtype=np.int64)
    idx = 0
    for a in range(chY):          # cee -> (0::2, 0::2)
        for b in range(chX):
            ky[idx], kx[idx] = 2 * a, 2 * b
            idx += 1
    for a in range(fhY):          # coo -> (1::2, 1::2)
        for b in range(fhX):
            ky[idx], kx[idx] = 2 * a + 1, 2 * b + 1
            idx += 1
    for a in range(fhY):          # coe -> (1::2, 0::2)
        for b in range(chX):
            ky[idx], kx[idx] = 2 * a + 1, 2 * b
            idx += 1
    for a in range(chY):          # ceo -> (0::2, 1::2)
        for b in range(fhX):
            ky[idx], kx[idx] = 2 * a, 2 * b + 1
            idx += 1

    E_T = np.zeros((nDecs, nDecs), dtype=np.float64)
    for j in range(nDecs):
        for br in range(decY):
            for bc in range(decX):
                E_T[j, br * decX + bc] = CY[ky[j], br] * CX[kx[j], bc]
    return E_T


# ----------------------------------------------------------------------------
# Grouping / tiling heuristics.
# ----------------------------------------------------------------------------
def _choose_group(ndecs, blocks_per_sample):
    """Pick G with G | blocks_per_sample, preferring G*ndecs a multiple of 128."""
    if ndecs % _LANE == 0:
        return 1
    best = 1
    for g in range(1, blocks_per_sample + 1):
        if blocks_per_sample % g:
            continue
        gn = g * ndecs
        if gn > 512:
            break
        if gn % _LANE == 0:
            return g        # smallest lane-dense grouping (GN in [128, 512])
        best = g
    return best


def _pick_tm(nbg_s, gn, ncomp, itemsize):
    """Row-tile: multi-MiB tiles, multiple of 8, conservative VMEM budget."""
    if nbg_s <= 8:
        return nbg_s                      # full extent (allowed even if <8)
    budget = 8 * 1024 * 1024              # total pipelined-tile budget (bytes)
    per_row = 4 * ncomp * gn * itemsize   # 2x dbl-buffer * (inputs + output)
    tm = max(8, min(budget // per_row, 2048, nbg_s))
    return int(tm // 8 * 8)


# ----------------------------------------------------------------------------
# Pallas kernel: fused, lane-dense block IDCT for all components.
# ----------------------------------------------------------------------------
def _make_idct_kernel(ncomp):
    def kernel(e_ref, *refs):
        # refs = (x_ref_0, ..., x_ref_{ncomp-1}, o_ref)
        o_ref = refs[-1]
        e = e_ref[...]                                  # (GN, GN), resident
        for c in range(ncomp):
            x = refs[c][0]                              # (tm, GN)
            o_ref[0, c] = jnp.dot(
                x, e, preferred_element_type=jnp.float32
            ).astype(o_ref.dtype)
    return kernel


def _block_idct_fused(xs_grouped, e_big):
    """xs_grouped: list of (nS, nbg_s, GN); e_big: (GN, GN).

    Returns (nS, nComp, nbg_s, GN) block pixels (row-major per block).
    """
    ncomp = len(xs_grouped)
    nsamples, nbg_s, gn = xs_grouped[0].shape
    dtype = xs_grouped[0].dtype
    itemsize = jnp.dtype(dtype).itemsize
    tm = _pick_tm(nbg_s, gn, ncomp, itemsize)
    nchunks = pl.cdiv(nbg_s, tm)

    flops = 2 * ncomp * nsamples * nbg_s * gn * gn
    bytes_accessed = (2 * ncomp * nsamples * nbg_s * gn + gn * gn) * itemsize

    out = pl.pallas_call(
        _make_idct_kernel(ncomp),
        out_shape=jax.ShapeDtypeStruct((nsamples, ncomp, nbg_s, gn), dtype),
        grid=(nsamples, nchunks),
        in_specs=(
            [pl.BlockSpec((gn, gn), lambda s, j: (0, 0))]          # E (resident)
            + [pl.BlockSpec((1, tm, gn), lambda s, j: (s, j, 0))   # components
               for _ in range(ncomp)]
        ),
        out_specs=pl.BlockSpec((1, ncomp, tm, gn), lambda s, j: (s, 0, j, 0)),
        compiler_params=pltpu.CompilerParams(
            dimension_semantics=("parallel", "parallel")),
        cost_estimate=pl.CostEstimate(
            flops=flops, transcendentals=0, bytes_accessed=bytes_accessed),
    )(e_big, *xs_grouped)
    return out


# ----------------------------------------------------------------------------
# Module-equivalent wrapper.
# ----------------------------------------------------------------------------
class LsunBlockIdct2dLayer:
    def __init__(self, name="", stride=(), number_of_components=1):
        self.stride = list(stride)
        self.name = name
        self.description = (
            "Block IDCT of size "
            + str(self.stride[VERTICAL]) + "x" + str(self.stride[HORIZONTAL])
        )
        self.num_inputs = number_of_components
        self._e_t_np = _build_idct_perm_matrix(self.stride)   # (nDecs, nDecs)
        self._ebig_cache = {}                                 # (G, dtype) -> jnp

    def _get_e_big(self, group, dtype):
        key = (group, jnp.dtype(dtype).name)
        if key not in self._ebig_cache:
            e_big = np.kron(np.eye(group), self._e_t_np)      # block-diagonal
            self._ebig_cache[key] = jnp.asarray(e_big, dtype=dtype)
        return self._ebig_cache[key]

    def __call__(self, *args):
        decY = self.stride[VERTICAL]
        decX = self.stride[HORIZONTAL]
        X0 = args[0]
        nsamples, nrows, ncols, ndecs = X0.shape
        assert ndecs == decY * decX, (ndecs, decY, decX)

        blocks_per_sample = nrows * ncols
        group = _choose_group(ndecs, blocks_per_sample)
        gn = group * ndecs
        nbg_s = blocks_per_sample // group

        e_big = self._get_e_big(group, X0.dtype)
        # Free row-major reshape: (nS, nR, nC, nDecs) -> (nS, nbg_s, G*nDecs)
        xs_grouped = [
            args[c].reshape(nsamples, nbg_s, gn) for c in range(self.num_inputs)
        ]
        out = _block_idct_fused(xs_grouped, e_big)   # (nS, nComp, nbg_s, GN)

        height = nrows * decY
        width = ncols * decX
        # Contiguous (free) reshape to NCHW, same flatten order as the torch code.
        return out.reshape(nsamples, self.num_inputs, height, width)


# ----------------------------------------------------------------------------
# Pure-JAX reference (mirrors the torch code: permute scatter + idct_2d).
# ----------------------------------------------------------------------------
def _ref_component(X, stride):
    decY, decX = stride[VERTICAL], stride[HORIZONTAL]
    ns, nr, nc, nd = X.shape
    chY, chX = -(-decY // 2), -(-decX // 2)
    fhY, fhX = decY // 2, decX // 2
    coefs = X.reshape(-1, nd)
    nB = coefs.shape[0]
    nee, noo, noe = chY * chX, fhY * fhX, fhY * chX
    cee = coefs[:, :nee].reshape(nB, chY, chX)
    coo = coefs[:, nee:nee + noo].reshape(nB, fhY, fhX)
    coe = coefs[:, nee + noo:nee + noo + noe].reshape(nB, fhY, chX)
    ceo = coefs[:, nee + noo + noe:].reshape(nB, chY, fhX)
    V = jnp.zeros((nB, decY, decX), X.dtype)
    V = V.at[:, 0::2, 0::2].set(cee)
    V = V.at[:, 1::2, 1::2].set(coo)
    V = V.at[:, 1::2, 0::2].set(coe)
    V = V.at[:, 0::2, 1::2].set(ceo)
    CY = jnp.asarray(_np_dct_matrix(decY), X.dtype)
    CX = jnp.asarray(_np_dct_matrix(decX), X.dtype)
    Y = jnp.einsum("kb,nkl,lc->nbc", CY, V, CX)
    return Y.reshape(ns, 1, nr * decY, nc * decX)


def _ref_forward(xs, stride):
    return jnp.concatenate([_ref_component(x, stride) for x in xs], axis=1)


# ----------------------------------------------------------------------------
# Demo / self-check.
# ----------------------------------------------------------------------------
def _run_case(stride, ncomp, nsamples, nrows, ncols, seed):
    ndecs = stride[0] * stride[1]
    key = jax.random.PRNGKey(seed)
    keys = jax.random.split(key, ncomp)
    xs = [
        jax.random.normal(k, (nsamples, nrows, ncols, ndecs), dtype=jnp.float32)
        for k in keys
    ]
    layer = LsunBlockIdct2dLayer(
        name="E0~", stride=stride, number_of_components=ncomp
    )
    out = jax.block_until_ready(layer(*xs))
    expected_shape = (nsamples, ncomp, nrows * stride[0], ncols * stride[1])
    assert out.shape == expected_shape, (out.shape, expected_shape)
    ref = jax.block_until_ready(_ref_forward(xs, stride))
    assert jnp.allclose(out, ref, atol=1e-4, rtol=1e-4), "mismatch vs reference"


if __name__ == "__main__":
    # Case 1: stride [2, 4] (nDecs=8, grouped to 128 lanes), 3 components.
    _run_case(stride=[2, 4], ncomp=3, nsamples=2, nrows=4, ncols=4, seed=0)
    # Case 2: stride [4, 4] (nDecs=16, grouped to 128 lanes), 2 components,
    # block count per sample not a power of two.
    _run_case(stride=[4, 4], ncomp=2, nsamples=2, nrows=10, ncols=4, seed=1)
    print("KERNEL_OK")
</pallas_src>

<mosaic_0001>
module attributes {stable_mosaic.version = 11 : i64} {
  func.func @kernel(%arg0: i32, %arg1: i32, %arg2: memref<128x128xf32, #tpu.memory_space<vmem>>, %arg3: memref<1x1x128xf32, #tpu.memory_space<vmem>>, %arg4: memref<1x1x128xf32, #tpu.memory_space<vmem>>, %arg5: memref<1x1x128xf32, #tpu.memory_space<vmem>>, %arg6: memref<1x3x1x128xf32, #tpu.memory_space<vmem>>) attributes {dimension_semantics = [#tpu.dimension_semantics<parallel>, #tpu.dimension_semantics<parallel>], iteration_bounds = array<i64: 2, 1>, scalar_prefetch = 0 : i64, scratch_operands = 0 : i64, tpu.core_type = #tpu.core_type<tc>, window_params = [{pipeline_mode = #tpu.pipeline_mode<synchronous>, transform_indices = @transform_0, window_bounds = array<i64: 128, 128>}, {transform_indices = @transform_1, window_bounds = array<i64: 1, 1, 128>}, {transform_indices = @transform_2, window_bounds = array<i64: 1, 1, 128>}, {transform_indices = @transform_3, window_bounds = array<i64: 1, 1, 128>}, {transform_indices = @transform_4, window_bounds = array<i64: 1, 3, 1, 128>}]} {
    %c0 = arith.constant 0 : index
    %c0_0 = arith.constant 0 : index
    %0 = vector.load %arg2[%c0, %c0_0] : memref<128x128xf32, #tpu.memory_space<vmem>>, vector<128x128xf32>
    %c0_1 = arith.constant 0 : index
    %c0_2 = arith.constant 0 : index
    %c0_3 = arith.constant 0 : index
    %1 = vector.load %arg3[%c0_1, %c0_2, %c0_3] : memref<1x1x128xf32, #tpu.memory_space<vmem>>, vector<1x1x128xf32>
    %2 = vector.shape_cast %1 : vector<1x1x128xf32> to vector<1x128xf32>
    %cst = arith.constant dense<0.000000e+00> : vector<1x128xf32>
    %3 = tpu.matmul %2, %0, %cst {dimension_numbers = #tpu.dot_dimension_numbers<[1], [0], [0], [1], [0, 0, 1, 1], [], []>} : vector<1x128xf32>, vector<128x128xf32>, vector<1x128xf32> -> vector<1x128xf32>
    %c0_4 = arith.constant 0 : index
    %c0_5 = arith.constant 0 : index
    %c0_6 = arith.constant 0 : index
    %c0_7 = arith.constant 0 : index
    %4 = vector.load %arg6[%c0_4, %c0_5, %c0_6, %c0_7] : memref<1x3x1x128xf32, #tpu.memory_space<vmem>>, vector<1x1x1x128xf32>
    %5 = vector.shape_cast %4 : vector<1x1x1x128xf32> to vector<1x128xf32>
    %6 = vector.shape_cast %3 : vector<1x128xf32> to vector<1x1x1x128xf32>
    tpu.vector_store %arg6[%c0_4, %c0_5, %c0_6, %c0_7], %6 {strides = array<i32>} : memref<1x3x1x128xf32, #tpu.memory_space<vmem>>, vector<1x1x1x128xf32>,
    %c0_8 = arith.constant 0 : index
    %c0_9 = arith.constant 0 : index
    %c0_10 = arith.constant 0 : index
    %7 = vector.load %arg4[%c0_8, %c0_9, %c0_10] : memref<1x1x128xf32, #tpu.memory_space<vmem>>, vector<1x1x128xf32>
    %8 = vector.shape_cast %7 : vector<1x1x128xf32> to vector<1x128xf32>
    %cst_11 = arith.constant dense<0.000000e+00> : vector<1x128xf32>
    %9 = tpu.matmul %8, %0, %cst_11 {dimension_numbers = #tpu.dot_dimension_numbers<[1], [0], [0], [1], [0, 0, 1, 1], [], []>} : vector<1x128xf32>, vector<128x128xf32>, vector<1x128xf32> -> vector<1x128xf32>
    %c0_12 = arith.constant 0 : index
    %c1 = arith.constant 1 : index
    %c0_13 = arith.constant 0 : index
    %c0_14 = arith.constant 0 : index
    %10 = vector.load %arg6[%c0_12, %c1, %c0_13, %c0_14] : memref<1x3x1x128xf32, #tpu.memory_space<vmem>>, vector<1x1x1x128xf32>
    %11 = vector.shape_cast %10 : vector<1x1x1x128xf32> to vector<1x128xf32>
    %12 = vector.shape_cast %9 : vector<1x128xf32> to vector<1x1x1x128xf32>
    tpu.vector_store %arg6[%c0_12, %c1, %c0_13, %c0_14], %12 {strides = array<i32>} : memref<1x3x1x128xf32, #tpu.memory_space<vmem>>, vector<1x1x1x128xf32>,
    %c0_15 = arith.constant 0 : index
    %c0_16 = arith.constant 0 : index
    %c0_17 = arith.constant 0 : index
    %13 = vector.load %arg5[%c0_15, %c0_16, %c0_17] : memref<1x1x128xf32, #tpu.memory_space<vmem>>, vector<1x1x128xf32>
    %14 = vector.shape_cast %13 : vector<1x1x128xf32> to vector<1x128xf32>
    %cst_18 = arith.constant dense<0.000000e+00> : vector<1x128xf32>
    %15 = tpu.matmul %14, %0, %cst_18 {dimension_numbers = #tpu.dot_dimension_numbers<[1], [0], [0], [1], [0, 0, 1, 1], [], []>} : vector<1x128xf32>, vector<128x128xf32>, vector<1x128xf32> -> vector<1x128xf32>
    %c0_19 = arith.constant 0 : index
    %c2 = arith.constant 2 : index
    %c0_20 = arith.constant 0 : index
    %c0_21 = arith.constant 0 : index
    %16 = vector.load %arg6[%c0_19, %c2, %c0_20, %c0_21] : memref<1x3x1x128xf32, #tpu.memory_space<vmem>>, vector<1x1x1x128xf32>
    %17 = vector.shape_cast %16 : vector<1x1x1x128xf32> to vector<1x128xf32>
    %18 = vector.shape_cast %15 : vector<1x128xf32> to vector<1x1x1x128xf32>
    tpu.vector_store %arg6[%c0_19, %c2, %c0_20, %c0_21], %18 {strides = array<i32>} : memref<1x3x1x128xf32, #tpu.memory_space<vmem>>, vector<1x1x1x128xf32>,
    return
  }
  func.func @transform_0(%arg0: i32, %arg1: i32) -> (i32, i32) {
    %c0_i32 = arith.constant 0 : i32
    %c0_i32_0 = arith.constant 0 : i32
    %c0_i32_1 = arith.constant 0 : i32
    return %c0_i32, %c0_i32_0 : i32, i32
  }
  func.func @transform_1(%arg0: i32, %arg1: i32) -> (i32, i32, i32) {
    %c0_i32 = arith.constant 0 : i32
    %c0_i32_0 = arith.constant 0 : i32
    return %arg0, %arg1, %c0_i32 : i32, i32, i32
  }
  func.func @transform_2(%arg0: i32, %arg1: i32) -> (i32, i32, i32) {
    %c0_i32 = arith.constant 0 : i32
    %c0_i32_0 = arith.constant 0 : i32
    return %arg0, %arg1, %c0_i32 : i32, i32, i32
  }
  func.func @transform_3(%arg0: i32, %arg1: i32) -> (i32, i32, i32) {
    %c0_i32 = arith.constant 0 : i32
    %c0_i32_0 = arith.constant 0 : i32
    return %arg0, %arg1, %c0_i32 : i32, i32, i32
  }
  func.func @transform_4(%arg0: i32, %arg1: i32) -> (i32, i32, i32, i32) {
    %c0_i32 = arith.constant 0 : i32
    %c0_i32_0 = arith.constant 0 : i32
    %c0_i32_1 = arith.constant 0 : i32
    return %arg0, %c0_i32, %arg1, %c0_i32_0 : i32, i32, i32, i32
  }
}

</mosaic_0001>

<bundles_post_ra>
// kernel: tpu_custom_call.1
= control target key start
LH: loop header
LB: loop body
LE: loop exit
PB: predicated region body
PF: predicated region fallthrough
CT: control target
= control target key end

     0   :  { %9 = vsyncpa [#allocation3], 0  ;;  %s1292_s0 = inlined_call_operand.hbm [shape: f32[128,128], index: 0, kind: input, shape index: {}]   ;;  %s1293_s1 = inlined_call_operand.vmem [shape: f32[2,1,128], index: 1, kind: input, shape index: {}]   ;;  %s1294_s2 = inlined_call_operand.vmem [shape: f32[2,1,128], index: 2, kind: input, shape index: {}]   ;;  %s1295_s3 = inlined_call_operand.vmem [shape: f32[2,1,128], index: 3, kind: input, shape index: {}]   ;;  %s1296_s4 = inlined_call_operand.hbm [shape: f32[2,3,1,128], index: 4, kind: output, shape index: {}]  }
   0x1   :  { %10 = vsyncpa [#allocation4], 0 }
   0x2   :  { %12 = vsyncpa [#allocation4 + $0x1], 0  ;;  %s1098_s15 = smov 0   ;;  %s1100_s16 = smov 0  }
   0x3   :  { %s1102_s17 = smov 0   ;;  %s1104_s18 = smov 0  }
   0x4   :  { %s1106_s19 = smov 0   ;;  %s1108_s20 = smov 0  }
   0x5 LB: > { %s637_s21 = sadd.s32 4294967295, %s1062_s20   ;;  %s638_s22 = sadd.s32 4294967294, %s1062_s20   ;;  %s1062_s20 = sphi %s1108_s20, %s18_s20   ;;  %s1058_s19 = sphi %s1106_s19, %s1314_s19   ;;  %s1054_s18 = sphi %s1104_s18, %s1313_s18   ;;  %s1050_s17 = sphi %s1102_s17, %s1312_s17   ;;  %s1046_s16 = sphi %s1100_s16, %s1311_s16   ;;  %s1042_s15 = sphi %s1098_s15, %s1310_s15  }
   0x6   : > { %s30_s23 = sadd.s32 1, %s1058_s19  ;;  %s144_s24 = sadd.s32 1, %s1050_s17 }
   0x7   : > { %p32_p0 = scmp.ge.s32.totalorder %s30_s23, 2  ;;  %p154_p1 = scmp.ne.s32.totalorder %s1050_s17, %s1046_s16 }
   0x8   : > { %p155_p2 = scmp.eq.s32.totalorder %s637_s21, 1  ;;  %p160_p3 = scmp.ne.s32.totalorder %s1046_s16, %s1042_s15 }
   0x9   : > { %s1316_s23 = smov (%p32_p0, %s30_s23), 0  ;;  %p161_p5 = scmp.eq.s32.totalorder %s638_s22, 1 }
   0xa   : > { %p1138_p4 = por %p155_p2, %p154_p1  ;;  %s139_s26 = ssub.s32 %s1058_s19, %s1316_s23 }
   0xb   : > { %p639_p6 = scmp.ge.s32.totalorder %s1062_s20, 1  ;;  %p142_p7 = scmp.eq.s32.totalorder %s139_s26, 0 }
   0xc   : > { %s1301_s25 = scalar_select %p1138_p4, 1, 0 }
   0xd   : > { %p1145_p8 = por %p161_p5, %p160_p3  ;;  %p168_p9 = scmp.lt.s32.totalorder %s1062_s20, 3 }
   0xe   : > { %s1151_s28 = scalar_select %p142_p7, %s1050_s17, %s144_s24  }
   0xf   : > { %s1302_s27 = scalar_select %p1145_p8, 1, 0 }
  0x10   : > { %p1153_p10 = pnand %p639_p6, %p168_p9  ;;  %p1157_p11 = scmp.eq.s32.totalorder %s637_s21, 0 }
  0x11   : > { %s1064_s5 = smov [#allocation2]   ;;  %s952_s10 = scalar_lea.hbm %s1292_s0, 2048 }
  0x12   : > { %s1303_s29 = scalar_select %p1153_p10, 1, 0 }
  0x13   : > { %s1304_s30 = scalar_select %p1157_p11, 1, 0 }
  0x14   : > { %p885_p12 = pneg %p1153_p10  ;;  %s180_s6 = sshll.u32 %s1064_s5, 4  ;;  %s181_s6 = int_to_ptr.vmem [resolvable:$true] %s180_s6 }
  0x15   : > { %p953_p0 = scmp.ne.s32.totalorder %s1292_s0, %s952_s10  ;;  %p959_p5 = scmp.lt.u32.totalorder %s952_s10, %s1292_s0 }
  0x16   : > { %p1165_p13 = pnand %p1157_p11, %p885_p12 }
  0x18   : > { %p954_p1 = pneg %p1165_p13 }
  0x1a   : > { %p955_p2 = pnand %p954_p1, %p953_p0 }
  0x1c   : > { %p956_p3 = pneg %p955_p2 }
  0x1e   : > { %p961_p6 = pnand %p959_p5, %p956_p3 }
  0x20   : > { %964 = shalt.err (!%p961_p6)
}
  0x21   : > { %s965_s21 = scalar_lea.vmem %s181_s6, 2048  ;;  %p973_p8 = scmp.lt.s32.totalorder %s181_s6, %s181_s6 }
  0x22   : > { %p966_p7 = scmp.ne.s32.totalorder %s181_s6, %s965_s21  ;;  %p974_p4 = scmp.lt.s32.totalorder %s965_s21, %s965_s21 }
  0x24   : > { %p968_p9 = pnand %p966_p7, %p954_p1  ;;  %p975_p11 = por %p974_p4, %p973_p8 }
  0x26   : > { %p969_p12 = pneg %p968_p9 }
  0x28   : > { %p976_p10 = pnand %p975_p11, %p969_p12 }
  0x2a   : > { %979 = shalt.err (!%p976_p10)
}
  0x2b   : > { %s1065_s22 = smov 128   ;;  %s1066_s24 = smov 8  }
  0x2c   : > { %888 = dma.hbm_to_vmem [thread:$0]  (!%p1165_p13), %s1292_s0, 2048, %s181_s6, [#allocation3], %s1065_s22, %s1065_s22, %s1066_s24  }
  0x2d   : > { %p1306_p0 = scmp.ne.s32.totalorder %s1303_s29, 0 }
  0x2e   : > { %p1307_p2 = scmp.ne.s32.totalorder (!%p1306_p0), %s1304_s30, 0 }
  0x2f   : > { %223 = sbr.rel (%p1306_p0) target bundleno = 349 (0x15d), region = 36 }
  0x36   : > { %1033 = dma.done.wait (%p1307_p2), [#allocation3], 2048  }
  0x37   : > { %1035 = vsyncadd (%p1307_p2), [#allocation3], 4294965248  ;;  %v1067_v0 = vmov 0.0|0.0   ;;  %vm1068_vm0 = vmmov 0   ;;  %v1069_v1 = vmov 0.0   ;;  %v280_v2 = vld [vmem:[#allocation2] sm:$0xff] }
  0x38   : > { %805 = vmatprep.subr.bf16.mxu0 %v1067_v0  ;;  %732 = vmatprep.mubr.msk.f32.mxu0 %vm1068_vm0, %v1069_v1  ;;  %v281_v3 = vld [vmem:[#allocation2 + $0x8] sm:$0xff]  ;;  %v282_v4 = vld [vmem:[#allocation2 + $0x10] sm:$0xff]  ;;  %v283_v6 = vld [vmem:[#allocation2 + $0x18] sm:$0xff]  ;;  %p262_p4 = scmp.lt.s32.totalorder %s1054_s18, 1  ;;  %s259_s14 = sand.u32 1, %s1046_s16  }
  0x39   : > { %829 = vmatprep.subr.bf16.mxu1 %v1067_v0  ;;  %767 = vmatprep.mubr.msk.f32.mxu1 %vm1068_vm0, %v1069_v1  ;;  %v806_v5 = vpack.c.bf16 %v281_v3, %v280_v2  ;;  %v809_v7 = vpack.c.bf16 %v283_v6, %v282_v4  ;;  %v284_v8 = vld [vmem:[#allocation2 + $0x20] sm:$0xff]  ;;  %v285_v9 = vld [vmem:[#allocation2 + $0x28] sm:$0xff]  ;;  %v286_v11 = vld [vmem:[#allocation2 + $0x30] sm:$0xff]  ;;  %s877_s21 = smul.u32 3, %s259_s14  ;;  %s1246_s6 = scalar_lea.sflag [#allocation4], %s259_s14 }
  0x3a   : > { %v812_v10 = vpack.c.bf16 %v285_v9, %v284_v8  ;;  %v287_v12 = vld [vmem:[#allocation2 + $0x38] sm:$0xff]  ;;  %v288_v14 = vld [vmem:[#allocation2 + $0x40] sm:$0xff]  ;;  %v289_v15 = vld [vmem:[#allocation2 + $0x48] sm:$0xff]  ;;  %s1210_s29 = scalar_select %p262_p4, %s1054_s18, 1 }
  0x3b   : > { %807 = vmatpush3.bf16.msra.mxu0 %v806_v5  ;;  %831 = vmatpush3.bf16.msra.mxu1 %v806_v5  ;;  %v815_v13 = vpack.c.bf16 %v287_v12, %v286_v11  ;;  %v818_v16 = vpack.c.bf16 %v289_v15, %v288_v14  ;;  %v290_v17 = vld [vmem:[#allocation2 + $0x50] sm:$0xff]  ;;  %v291_v18 = vld [vmem:[#allocation2 + $0x58] sm:$0xff]  ;;  %v292_v20 = vld [vmem:[#allocation2 + $0x60] sm:$0xff]  ;;  %s261_s22 = scalar_lea.vmem [#allocation5], %s877_s21  ;;  %s878_s24 = smul.u32 48, %s1054_s18 }
  0x3c   : > { %808 = vmatprep.subr.bf16.mxu0 %v1067_v0  ;;  %832 = vmatprep.subr.bf16.mxu1 %v1067_v0  ;;  %v821_v19 = vpack.c.bf16 %v291_v18, %v290_v17  ;;  %v293_v21 = vld [vmem:[#allocation2 + $0x68] sm:$0xff]  ;;  %v294_v23 = vld [vmem:[#allocation2 + $0x70] sm:$0xff]  ;;  %v295_v24 = vld [vmem:[#allocation2 + $0x78] sm:$0xff]  ;;  %s267_s7 = scalar_lea.vmem %s1293_s1, %s1210_s29  ;;  %s273_s10 = scalar_lea.vmem %s1294_s2, %s1210_s29 }
  0x3d   : > { %v824_v22 = vpack.c.bf16 %v293_v21, %v292_v20  ;;  %v827_v25 = vpack.c.bf16 %v295_v24, %v294_v23  ;;  %v296_v26 = vld [vmem:[%s267_s7] sm:$0x1]  ;;  %s279_s13 = scalar_lea.vmem %s1295_s3, %s1210_s29  ;;  %s529_s26 = sshll.u32 %s261_s22, 4  ;;  %s1239_s26 = int_to_ptr.vmem [resolvable:$true] %s529_s26 }
  0x3e   : > { %v368_v27 = vld [vmem:[%s273_s10] sm:$0x1]  ;;  %s1244_s29 = scalar_lea.hbm %s1296_s4, %s878_s24  ;;  %s980_s7 = scalar_lea.vmem %s1239_s26, 48 }
  0x3f   : > { %810 = vmatpush3.bf16.msra.mxu0 %v809_v7  ;;  %834 = vmatpush3.bf16.msra.mxu1 %v809_v7  ;;  %v441_v28 = vld [vmem:[%s279_s13] sm:$0x1]  ;;  %p981_p8 = scmp.ne.s32.totalorder %s1239_s26, %s980_s7  ;;  %p1308_p10 = scmp.ne.s32.totalorder %s1301_s25, 0 }
  0x40   : > { %811 = vmatprep.subr.bf16.mxu0 %v1067_v0  ;;  %835 = vmatprep.subr.bf16.mxu1 %v1067_v0  ;;  %s1070_s18 = smov [#allocation5]  }
  0x41   : > { %p982_p11 = pnand %p981_p8, %p1308_p10  ;;  %s984_s8 = sshll.u32 %s1070_s18, 4  ;;  %s985_s8 = int_to_ptr.vmem [resolvable:$false] %s984_s8 }
  0x42   : > { %s986_s9 = scalar_lea.vmem %s985_s8, 96  ;;  %p987_p1 = scmp.lt.s32.totalorder %s1239_s26, %s985_s8 }
  0x43   : > { %813 = vmatpush3.bf16.msra.mxu0 %v812_v10  ;;  %837 = vmatpush3.bf16.msra.mxu1 %v812_v10  ;;  %p983_p13 = pneg %p982_p11  ;;  %p988_p3 = scmp.lt.s32.totalorder %s986_s9, %s980_s7 }
  0x44   : > { %814 = vmatprep.subr.bf16.mxu0 %v1067_v0  ;;  %838 = vmatprep.subr.bf16.mxu1 %v1067_v0 }
  0x45   : > { %p989_p5 = por %p988_p3, %p987_p1 }
  0x47   : > { %816 = vmatpush3.bf16.msra.mxu0 %v815_v13  ;;  %840 = vmatpush3.bf16.msra.mxu1 %v815_v13  ;;  %p990_p6 = pnand %p989_p5, %p983_p13 }
  0x48   : > { %817 = vmatprep.subr.bf16.mxu0 %v1067_v0  ;;  %841 = vmatprep.subr.bf16.mxu1 %v1067_v0 }
  0x4b   : > { %819 = vmatpush3.bf16.msra.mxu0 %v818_v16  ;;  %843 = vmatpush3.bf16.msra.mxu1 %v818_v16 }
  0x4c   : > { %820 = vmatprep.subr.bf16.mxu0 %v1067_v0  ;;  %844 = vmatprep.subr.bf16.mxu1 %v1067_v0 }
  0x4f   : > { %822 = vmatpush3.bf16.msra.mxu0 %v821_v19  ;;  %846 = vmatpush3.bf16.msra.mxu1 %v821_v19 }
  0x50   : > { %823 = vmatprep.subr.bf16.mxu0 %v1067_v0  ;;  %847 = vmatprep.subr.bf16.mxu1 %v1067_v0 }
  0x53   : > { %825 = vmatpush3.bf16.msra.mxu0 %v824_v22  ;;  %849 = vmatpush3.bf16.msra.mxu1 %v824_v22 }
  0x54   : > { %826 = vmatprep.subr.bf16.mxu0 %v1067_v0  ;;  %850 = vmatprep.subr.bf16.mxu1 %v1067_v0 }
  0x57   : > { %828 = vmatpush3.bf16.msra.mxu0 %v827_v25  ;;  %852 = vmatpush3.bf16.msra.mxu1 %v827_v25 }
  0x58   : > { %853 = vmatprep.subr.bf16.mxu0 %v1067_v0 }
  0x5a   : > { %733 = vmatmul.mubr.f32.vlgmr.msra.gmra.mrb[0].mxu0 %v296_v26  ;;  %768 = vmatmul.mubr.f32.vlgmr.msra.gmra.mrb[0].mxu1 %v368_v27 }
  0x5b   : > { %855 = vmatpush3.bf16.msra.mxu0 %v806_v5  ;;  %802 = vmatprep.mubr.msk.f32.mxu0 %vm1068_vm0, %v1069_v1 }
  0x5c   : > { %856 = vmatprep.subr.bf16.mxu0 %v1067_v0 }
  0x5f   : > { %858 = vmatpush3.bf16.msra.mxu0 %v809_v7 }
  0x60   : > { %859 = vmatprep.subr.bf16.mxu0 %v1067_v0 }
  0x63   : > { %861 = vmatpush3.bf16.msra.mxu0 %v812_v10 }
  0x64   : > { %862 = vmatprep.subr.bf16.mxu0 %v1067_v0 }
  0x67   : > { %864 = vmatpush3.bf16.msra.mxu0 %v815_v13 }
  0x68   : > { %865 = vmatprep.subr.bf16.mxu0 %v1067_v0 }
  0x6b   : > { %867 = vmatpush3.bf16.msra.mxu0 %v818_v16 }
  0x6c   : > { %868 = vmatprep.subr.bf16.mxu0 %v1067_v0 }
  0x6f   : > { %870 = vmatpush3.bf16.msra.mxu0 %v821_v19 }
  0x70   : > { %871 = vmatprep.subr.bf16.mxu0 %v1067_v0 }
  0x73   : > { %873 = vmatpush3.bf16.msra.mxu0 %v824_v22 }
  0x74   : > { %874 = vmatprep.subr.bf16.mxu0 %v1067_v0 }
  0x77   : > { %876 = vmatpush3.bf16.msra.mxu0 %v827_v25 }
  0x7a   : > { %803 = vmatmul.mubr.f32.vlgmr.msra.gmra.mrb[2].mxu0 %v441_v28 }
 0x12d   : > { %v363_v29 = vpop.f32.mrb[0].mxu0  ;;  %v435_v30 = vpop.f32.mrb[0].mxu1 }
 0x12e   : > { %367 = vst [vmem:[%s261_s22] sm:$0x1] %v363_v29  ;;  %v734_v31 = vpop.f32.mrb[1].mxu0  ;;  %644 = vst [vmem:[%s261_s22 + $0x1] sm:$0x1] %v435_v30  ;;  %v769_v32 = vpop.f32.mrb[1].mxu1 }
 0x14d   : > { %v508_v33 = vpop.f32.mrb[2].mxu0 }
 0x14e   : > { %645 = vst [vmem:[%s261_s22 + $0x2] sm:$0x1] %v508_v33  ;;  %v804_v34 = vpop.f32.mrb[3].mxu0 }
 0x14f   : > { %993 = shalt.err (!%p990_p6)
}
 0x150   : > { %s994_s10 = scalar_lea.hbm %s1244_s29, 48  ;;  %s998_s13 = scalar_lea.hbm %s1296_s4, 96 }
 0x151   : > { %p995_p7 = scmp.ne.s32.totalorder %s1244_s29, %s994_s10  ;;  %p999_p0 = scmp.lt.u32.totalorder %s1244_s29, %s1296_s4 }
 0x152   : > { %p1000_p2 = scmp.lt.u32.totalorder %s998_s13, %s994_s10  ;;  %p1002_p8 = scmp.lt.u32.totalorder %s994_s10, %s1244_s29 }
 0x153   : > { %p996_p9 = pnand %p995_p7, %p1308_p10 }
 0x154   : > { %p1001_p4 = por %p1000_p2, %p999_p0 }
 0x155   : > { %p997_p12 = pneg %p996_p9 }
 0x156   : > { %p1003_p11 = por %p1002_p8, %p1001_p4 }
 0x158   : > { %p1004_p13 = pnand %p1003_p11, %p997_p12 }
 0x15a   : > { %1007 = shalt.err (!%p1004_p13)
}
 0x15b   : > { %s1071_s22 = smov 16   ;;  %s1072_s24 = smov 1  }
 0x15c   : > { %883 = dma.vmem_to_hbm [thread:$0]  (%p1308_p10), %s1239_s26, 48, %s1244_s29, %s1246_s6, %s1071_s22, %s1071_s22, %s1072_s24  }
 0x15d PF: > { %p895_p1 = scmp.ge.s32.totalorder %s1062_s20, 2  ;;  %s544_s5 = sand.u32 1, %s1042_s15  }
 0x15e   : > { %p1309_p3 = scmp.ne.s32.totalorder %s1302_s27, 0  ;;  %s545_s30 = scalar_lea.sflag [#allocation4], %s544_s5 }
 0x160   : > { %p890_p5 = pnand %p895_p1, %p1309_p3 }
 0x162   : > { %1037 = dma.done.wait (!%p890_p5), %s545_s30, 48  }
 0x163   : > { %1039 = vsyncadd (!%p890_p5), %s545_s30, 4294967248  ;;  %s18_s20 = sadd.s32 1, %s1062_s20   ;;  %s1310_s15 = smov %s1046_s16 }
 0x164   : > { %p15_p6 = scmp.ge.s32.totalorder %s18_s20, 4   ;;  %s1311_s16 = smov %s1050_s17 }
 0x165   : > { %s1312_s17 = smov %s1151_s28  ;;  %s1313_s18 = smov %s1058_s19 }
 0x166   : > { %s1314_s19 = smov %s1316_s23  ;;  %17 = sbr.rel (!%p15_p6) target bundleno = 5 (0x5), region = 84 }
 0x16d   :  { %550 = vsyncpa [#allocation3], 1 }
 0x16e   :  { %552 = vsyncpa [#allocation3 + $0x1], 1 }
 0x16f   :  { %553 = vsyncpa [#allocation4], 1 }
 0x170   :  { %555 = vsyncpa [#allocation4 + $0x1], 1 }

</bundles_post_ra>
